<compile_context>
chip_gen: v7x
topology: tpu7x:2x2x1
jax: 0.10.0
libtpu: 0.0.40
codegen_flags: <defaults>
</compile_context>

<pallas_src>
import jax
import jax.numpy as jnp
from jax.experimental import pallas as pl
from jax.experimental.pallas import tpu as pltpu


# --------------------------------------------------------------------------
# Pallas kernel: fused FMaggregator + (degenerate) attention + p_liner + sigmoid
# --------------------------------------------------------------------------
def afm_kernel(user_ref, item_ref, wp_ref, bp_ref, out_ref):
    """One batch tile; batch on sublanes, K on lanes.

      user_ref : (TB, K)     user embedding rows, bf16
      item_ref : (TB, F*K)   item-feature embedding rows (flattened), bf16
      wp_ref   : (1, K)      p_liner weight row, f32 (resident across the grid)
      bp_ref   : (1,)        p_liner bias, f32 (SMEM scalar)
      out_ref  : (TB, 1)     sigmoid(logit), f32
    """
    k = wp_ref.shape[1]
    nf = item_ref.shape[1] // k

    # Upcast immediately after load (v5e VPU has no bf16); accumulate in f32.
    u = user_ref[...].astype(jnp.float32)                # (TB, K)
    items = item_ref[...].astype(jnp.float32)            # (TB, F*K)

    sum_f = u
    sum_sq = u * u
    # FMaggregator: unrolled VPU adds over the small static feature axis.
    for f in range(nf):
        x = items[:, f * k:(f + 1) * k]                  # (TB, K) lane slice
        sum_f = sum_f + x
        sum_sq = sum_sq + x * x
    embs = sum_f * sum_f - sum_sq                        # (TB, K)

    # attention(): softmax over dim=1 of a (B, 1) tensor is identically 1.0,
    # so atts == 1 and the a_liner/relu/h_liner MLP has no effect on the
    # output.  It is elided here (bit-identical to the PyTorch module); the
    # pure-JAX reference below keeps it and the script asserts equivalence.

    # p_liner(atts * embs) with atts == 1: VPU broadcast-multiply + lane reduce
    # over K (an N=1 MXU matmul would waste 255/256 of the MXU).
    logit = jnp.sum(embs * wp_ref[...], axis=-1, keepdims=True) + bp_ref[0]
    out_ref[...] = 1.0 / (1.0 + jnp.exp(-logit))         # sigmoid, (TB, 1)


# --------------------------------------------------------------------------
# Tiling / pallas_call wrapper
# --------------------------------------------------------------------------
_MAX_TB = 8192      # rows per grid step; ~2 MiB of bf16 features per tile
_TB_ALIGN = 16      # bf16 sublane tile is (16, 128)


def _round_up(x, m):
    return ((x + m - 1) // m) * m


def _choose_tile(batch, tb):
    if tb is not None:
        tb = _round_up(max(tb, _TB_ALIGN), _TB_ALIGN)
    elif batch < 256:
        tb = _round_up(batch, _TB_ALIGN)            # single small tile
    else:
        # >= 2 (even) grid steps so v7x's two TensorCores both get work;
        # cap the tile so per-step HBM time stays well above the ~0.35 us
        # fixed per-grid-step overhead without blowing up VMEM.
        g = max(2, -(-batch // _MAX_TB))
        if g % 2:
            g += 1
        tb = min(_round_up(-(-batch // g), _TB_ALIGN), _MAX_TB)
    b_pad = _round_up(batch, tb)
    return tb, b_pad


def afm_pallas(user_feats, item_feats, wp_row, bp, *, tb):
    """user_feats: (B_pad, K) bf16, item_feats: (B_pad, F*K) bf16 -> (B_pad, 1) f32."""
    b_pad, k_dim = user_feats.shape
    fk = item_feats.shape[1]
    grid = (b_pad // tb,)
    return pl.pallas_call(
        afm_kernel,
        out_shape=jax.ShapeDtypeStruct((b_pad, 1), jnp.float32),
        grid=grid,
        in_specs=[
            pl.BlockSpec((tb, k_dim), lambda b: (b, 0)),           # user feats
            pl.BlockSpec((tb, fk), lambda b: (b, 0)),              # item feats (flat)
            pl.BlockSpec((1, k_dim), lambda b: (0, 0)),            # wp (resident)
            pl.BlockSpec(memory_space=pltpu.MemorySpace.SMEM),     # bp scalar
        ],
        out_specs=pl.BlockSpec((tb, 1), lambda b: (b, 0)),
        compiler_params=pltpu.CompilerParams(
            dimension_semantics=("parallel",),     # megacore split on v7x
            vmem_limit_bytes=32 * 1024 * 1024,
        ),
    )(user_feats, item_feats, wp_row, bp)


# --------------------------------------------------------------------------
# Plain-JAX glue: gather + lookup-only max_norm renorm (data-dependent gather
# has no clean single-BlockSpec expression; see TODO at top of file).
# --------------------------------------------------------------------------
def _renorm_rows(rows, max_norm=1.0, eps=1e-7):
    # Mirrors nn.Embedding(max_norm=1): rows with L2 norm > max_norm are scaled
    # by max_norm / (norm + 1e-7).  Applied per *gathered* row only.
    norm = jnp.linalg.norm(rows, axis=-1, keepdims=True)
    scale = jnp.where(norm > max_norm, max_norm / (norm + eps), 1.0)
    return rows * scale


def afm_forward(u, i, params, *, tb=None):
    users_tbl = params["users"].astype(jnp.float32)         # (n_users, K)
    itemf_tbl = params["item_features"].astype(jnp.float32) # (n_feat_vals, K)
    item_df = params["item_df"]                             # (n_items, F_item)

    batch = u.shape[0]
    k_dim = users_tbl.shape[1]
    f_item = item_df.shape[1]

    tb_, b_pad = _choose_tile(batch, tb)
    if b_pad != batch:
        pad = b_pad - batch
        # Pad the (tiny) index vectors, NOT the gathered feature slab.
        u = jnp.concatenate([u, jnp.zeros((pad,), u.dtype)])
        i = jnp.concatenate([i, jnp.zeros((pad,), i.dtype)])

    idx = item_df[i]                                        # (b_pad, F_item)

    # Gather + per-row renorm, in the kernel's natural layout (no transposes).
    user_rows = _renorm_rows(users_tbl[u])                  # (b_pad, K)       f32
    item_rows = _renorm_rows(itemf_tbl[idx])                # (b_pad, F, K)    f32

    # Ship features in bf16 (halves HBM bytes of the dominant traffic); the
    # kernel upcasts and accumulates in f32.
    user_feats = user_rows.astype(jnp.bfloat16)                           # (b_pad, K)
    item_feats = item_rows.astype(jnp.bfloat16).reshape(b_pad, f_item * k_dim)

    wp_row = params["wp"].astype(jnp.float32).reshape(1, k_dim)           # (1, K)
    bp = params["bp"].astype(jnp.float32).reshape(-1)                     # (1,)

    out = afm_pallas(user_feats, item_feats, wp_row, bp, tb=tb_)          # (b_pad, 1)
    return out[:batch, 0]                                                 # (B,)


# --------------------------------------------------------------------------
# Pure-JAX reference (full module math, incl. the attention MLP + softmax,
# and the original "renorm whole table then gather" formulation).
# --------------------------------------------------------------------------
def afm_reference(u, i, params):
    def renorm_table(t, max_norm=1.0, eps=1e-7):
        n = jnp.linalg.norm(t, axis=-1, keepdims=True)
        return t * jnp.where(n > max_norm, max_norm / (n + eps), 1.0)

    users_w = renorm_table(params["users"])
    itemf_w = renorm_table(params["item_features"])
    idx = params["item_df"][i]

    feats = jnp.concatenate([users_w[u][:, None, :], itemf_w[idx]], axis=1)  # (B,F+1,K)
    sum_f = jnp.sum(feats, axis=1)
    embs = sum_f ** 2 - jnp.sum(feats ** 2, axis=1)                          # (B,K)

    a = jnp.maximum(embs @ params["wa"] + params["ba"], 0.0)                 # (B,T)
    h = a @ params["wh"] + params["bh"]                                      # (B,1)
    atts = jax.nn.softmax(h, axis=1)                                         # == 1.0
    out = (atts * embs) @ params["wp"] + params["bp"]                        # (B,1)
    return jax.nn.sigmoid(jnp.squeeze(out, axis=-1))


# --------------------------------------------------------------------------
if __name__ == "__main__":
    # small shapes consistent with the module
    n_users, n_items, n_item_feats = 10, 12, 3
    n_feat_vals = 20                       # item_df.values.max() + 1
    k_dim, t_dim, batch = 32, 16, 8

    key = jax.random.PRNGKey(0)
    keys = jax.random.split(key, 14)

    item_df = jax.random.randint(keys[0], (n_items, n_item_feats), 0, n_feat_vals,
                                 dtype=jnp.int32)

    params = {
        "item_df": item_df,
        # embeddings (some rows have norm > 1, exercising max_norm renorm)
        "users": jax.random.normal(keys[1], (n_users, k_dim), jnp.float32) * 0.5,
        "item_features": jax.random.normal(keys[2], (n_feat_vals, k_dim),
                                           jnp.float32) * 0.5,
        # a_liner / h_liner: only used by the reference (mathematically dead
        # in the forward pass because softmax is over a size-1 axis)
        "wa": jax.random.normal(keys[3], (k_dim, t_dim), jnp.float32) * 0.1,
        "ba": jax.random.normal(keys[4], (1, t_dim), jnp.float32) * 0.1,
        "wh": jax.random.normal(keys[5], (t_dim, 1), jnp.float32) * 0.1,
        "bh": jax.random.normal(keys[6], (1, 1), jnp.float32) * 0.1,
        # p_liner: k_dim -> 1
        "wp": jax.random.normal(keys[7], (k_dim, 1), jnp.float32) * 0.1,
        "bp": jax.random.normal(keys[8], (1, 1), jnp.float32) * 0.1,
    }

    # bf16 feature transfer -> slightly relaxed tolerance (accumulation in f32)
    ATOL = RTOL = 5e-3

    # --- test 1: tiny batch, single tile ---
    u = jax.random.randint(keys[9], (batch,), 0, n_users, dtype=jnp.int32)
    i = jax.random.randint(keys[10], (batch,), 0, n_items, dtype=jnp.int32)
    out1 = afm_forward(u, i, params)
    jax.block_until_ready(out1)
    ref1 = afm_reference(u, i, params)
    assert out1.shape == (batch,)
    assert jnp.allclose(out1, ref1, atol=ATOL, rtol=RTOL), (out1, ref1)

    # --- test 2: explicit small tile -> multi-step grid + index padding path ---
    batch2 = 200
    u2 = jax.random.randint(keys[11], (batch2,), 0, n_users, dtype=jnp.int32)
    i2 = jax.random.randint(keys[12], (batch2,), 0, n_items, dtype=jnp.int32)
    out2 = afm_forward(u2, i2, params, tb=64)       # grid=(4,), b_pad=256
    jax.block_until_ready(out2)
    ref2 = afm_reference(u2, i2, params)
    assert out2.shape == (batch2,)
    assert jnp.allclose(out2, ref2, atol=ATOL, rtol=RTOL), (out2, ref2)

    # --- test 3: batch >= 256 -> default tiling with an even, >=2-step grid ---
    batch3 = 300
    u3 = jax.random.randint(keys[13], (batch3,), 0, n_users, dtype=jnp.int32)
    i3 = jax.random.randint(jax.random.fold_in(key, 99), (batch3,), 0, n_items,
                            dtype=jnp.int32)
    out3 = afm_forward(u3, i3, params)              # grid=(2,), tb=160
    jax.block_until_ready(out3)
    ref3 = afm_reference(u3, i3, params)
    assert out3.shape == (batch3,)
    assert jnp.allclose(out3, ref3, atol=ATOL, rtol=RTOL), (out3, ref3)

    print("KERNEL_OK")
</pallas_src>

<mosaic_0001>
module attributes {stable_mosaic.version = 11 : i64} {
  func.func @afm_kernel(%arg0: i32, %arg1: memref<16x32xbf16, #tpu.memory_space<vmem>>, %arg2: memref<16x96xbf16, #tpu.memory_space<vmem>>, %arg3: memref<1x32xf32, #tpu.memory_space<vmem>>, %arg4: memref<1xf32, #tpu.memory_space<smem>>, %arg5: memref<16x1xf32, #tpu.memory_space<vmem>>) attributes {dimension_semantics = [#tpu.dimension_semantics<parallel>], iteration_bounds = array<i64: 1>, scalar_prefetch = 0 : i64, scratch_operands = 0 : i64, tpu.core_type = #tpu.core_type<tc>, window_params = [{transform_indices = @transform_0, window_bounds = array<i64: 16, 32>}, {transform_indices = @transform_1, window_bounds = array<i64: 16, 96>}, {pipeline_mode = #tpu.pipeline_mode<synchronous>, transform_indices = @transform_2, window_bounds = array<i64: 1, 32>}, {transform_indices = @transform_3, window_bounds = array<i64: 1>}, {transform_indices = @transform_4, window_bounds = array<i64: 16, 1>}]} {
    %c0 = arith.constant 0 : index
    %c0_0 = arith.constant 0 : index
    %0 = vector.load %arg1[%c0, %c0_0] : memref<16x32xbf16, #tpu.memory_space<vmem>>, vector<16x32xbf16>
    %1 = arith.extf %0 : vector<16x32xbf16> to vector<16x32xf32>
    %c0_1 = arith.constant 0 : index
    %c0_2 = arith.constant 0 : index
    %2 = vector.load %arg2[%c0_1, %c0_2] : memref<16x96xbf16, #tpu.memory_space<vmem>>, vector<16x96xbf16>
    %3 = arith.extf %2 : vector<16x96xbf16> to vector<16x96xf32>
    %4 = arith.mulf %1, %1 : vector<16x32xf32>
    %5 = vector.extract_strided_slice %3 {offsets = [0, 0], sizes = [16, 32], strides = [1, 1]} : vector<16x96xf32> to vector<16x32xf32>
    %6 = arith.addf %1, %5 : vector<16x32xf32>
    %7 = arith.mulf %5, %5 : vector<16x32xf32>
    %8 = arith.addf %4, %7 : vector<16x32xf32>
    %9 = vector.extract_strided_slice %3 {offsets = [0, 32], sizes = [16, 32], strides = [1, 1]} : vector<16x96xf32> to vector<16x32xf32>
    %10 = arith.addf %6, %9 : vector<16x32xf32>
    %11 = arith.mulf %9, %9 : vector<16x32xf32>
    %12 = arith.addf %8, %11 : vector<16x32xf32>
    %13 = vector.extract_strided_slice %3 {offsets = [0, 64], sizes = [16, 32], strides = [1, 1]} : vector<16x96xf32> to vector<16x32xf32>
    %14 = arith.addf %10, %13 : vector<16x32xf32>
    %15 = arith.mulf %13, %13 : vector<16x32xf32>
    %16 = arith.addf %12, %15 : vector<16x32xf32>
    %17 = arith.mulf %14, %14 : vector<16x32xf32>
    %18 = arith.subf %17, %16 : vector<16x32xf32>
    %c0_3 = arith.constant 0 : index
    %c0_4 = arith.constant 0 : index
    %19 = vector.load %arg3[%c0_3, %c0_4] : memref<1x32xf32, #tpu.memory_space<vmem>>, vector<1x32xf32>
    %20 = vector.broadcast %19 : vector<1x32xf32> to vector<16x32xf32>
    %21 = arith.mulf %18, %20 : vector<16x32xf32>
    %cst = arith.constant dense<0.000000e+00> : vector<16xf32>
    %22 = vector.multi_reduction <add>, %21, %cst [1] : vector<16x32xf32> to vector<16xf32>
    %23 = vector.shape_cast %22 : vector<16xf32> to vector<16x1xf32>
    %c0_5 = arith.constant 0 : index
    %24 = memref.load %arg4[%c0_5] : memref<1xf32, #tpu.memory_space<smem>>
    %25 = vector.broadcast %24 : f32 to vector<16x1xf32>
    %26 = arith.addf %23, %25 : vector<16x1xf32>
    %cst_6 = arith.constant 0.000000e+00 : f32
    %27 = vector.broadcast %cst_6 : f32 to vector<16x1xf32>
    %28 = arith.subf %27, %26 : vector<16x1xf32>
    %29 = math.exp %28 : vector<16x1xf32>
    %cst_7 = arith.constant 1.000000e+00 : f32
    %30 = vector.broadcast %cst_7 : f32 to vector<16x1xf32>
    %31 = arith.addf %30, %29 : vector<16x1xf32>
    %cst_8 = arith.constant 1.000000e+00 : f32
    %32 = vector.broadcast %cst_8 : f32 to vector<16x1xf32>
    %33 = arith.divf %32, %31 : vector<16x1xf32>
    %c0_9 = arith.constant 0 : index
    %c0_10 = arith.constant 0 : index
    %34 = vector.load %arg5[%c0_9, %c0_10] : memref<16x1xf32, #tpu.memory_space<vmem>>, vector<16x1xf32>
    tpu.vector_store %arg5[%c0_9, %c0_10], %33 {strides = array<i32>} : memref<16x1xf32, #tpu.memory_space<vmem>>, vector<16x1xf32>,
    return
  }
  func.func @transform_0(%arg0: i32) -> (i32, i32) {
    %c0_i32 = arith.constant 0 : i32
    %c0_i32_0 = arith.constant 0 : i32
    return %arg0, %c0_i32 : i32, i32
  }
  func.func @transform_1(%arg0: i32) -> (i32, i32) {
    %c0_i32 = arith.constant 0 : i32
    %c0_i32_0 = arith.constant 0 : i32
    return %arg0, %c0_i32 : i32, i32
  }
  func.func @transform_2(%arg0: i32) -> (i32, i32) {
    %c0_i32 = arith.constant 0 : i32
    %c0_i32_0 = arith.constant 0 : i32
    %c0_i32_1 = arith.constant 0 : i32
    return %c0_i32, %c0_i32_0 : i32, i32
  }
  func.func @transform_3(%arg0: i32) -> i32 {
    %c0_i32 = arith.constant 0 : i32
    %c0_i32_0 = arith.constant 0 : i32
    return %c0_i32 : i32
  }
  func.func @transform_4(%arg0: i32) -> (i32, i32) {
    %c0_i32 = arith.constant 0 : i32
    %c0_i32_0 = arith.constant 0 : i32
    return %arg0, %c0_i32 : i32, i32
  }
}

</mosaic_0001>

<bundles_post_ra>
// kernel: tpu_custom_call.1
= control target key start
LH: loop header
LB: loop body
LE: loop exit
PB: predicated region body
PF: predicated region fallthrough
CT: control target
= control target key end

     0   :  { %10 = vsyncpa [#allocation4], 0  ;;  %s300_s0 = inlined_call_operand.hbm [shape: bf16[16,32], index: 0, kind: input, shape index: {}]   ;;  %s301_s1 = inlined_call_operand.hbm [shape: bf16[16,96], index: 1, kind: input, shape index: {}]   ;;  %s302_s2 = inlined_call_operand.vmem [shape: f32[1,32], index: 2, kind: input, shape index: {}]   ;;  %s303_s3 = inlined_call_operand.<no memory space> [shape: f32[1], index: 3, kind: input, shape index: {}]   ;;  %s304_s4 = inlined_call_operand.vmem [shape: f32[16,1], index: 4, kind: output, shape index: {}]  }
   0x1   :  { %11 = vsyncpa [#allocation6], 0  ;;  %s227_s15 = smov [#allocation3]   ;;  %s179_s19 = scalar_lea.hbm %s300_s0, 128 }
   0x2   :  { %s17_s16 = sshll.u32 %s227_s15, 4  ;;  %p180_p0 = scmp.ne.s32.totalorder %s300_s0, %s179_s19  ;;  %s18_s16 = int_to_ptr.vmem [resolvable:$true] %s17_s16 }
   0x3   :  { %p183_p1 = scmp.lt.u32.totalorder %s179_s19, %s300_s0 }
   0x5   :  { %p185_p2 = pnand %p183_p1, %p180_p0 }
   0x7   :  { %188 = shalt.err (!%p185_p2)
}
   0x8   :  { %s189_s24 = scalar_lea.vmem %s18_s16, 128  ;;  %p194_p4 = scmp.lt.s32.totalorder %s18_s16, %s18_s16 }
   0x9   :  { %p190_p3 = scmp.ne.s32.totalorder %s18_s16, %s189_s24  ;;  %p195_p5 = scmp.lt.s32.totalorder %s189_s24, %s189_s24 }
   0xb   :  { %p196_p6 = por %p195_p5, %p194_p4 }
   0xd   :  { %p197_p7 = pnand %p196_p6, %p190_p3 }
   0xf   :  { %200 = shalt.err (!%p197_p7)
}
  0x10   :  { %s228_s25 = smov 64   ;;  %s229_s26 = smov 4  }
  0x11   :  { %23 = dma.hbm_to_vmem [thread:$0]  %s300_s0, 128, %s18_s16, [#allocation4], %s228_s25, %s228_s25, %s229_s26  }
  0x12   :  { %s230_s29 = smov [#allocation5]   ;;  %s201_s7 = scalar_lea.hbm %s301_s1, 128 }
  0x13   :  { %s29_s30 = sshll.u32 %s230_s29, 4  ;;  %p202_p8 = scmp.ne.s32.totalorder %s301_s1, %s201_s7  ;;  %s30_s30 = int_to_ptr.vmem [resolvable:$true] %s29_s30 }
  0x14   :  { %p205_p9 = scmp.lt.u32.totalorder %s201_s7, %s301_s1 }
  0x16   :  { %p207_p10 = pnand %p205_p9, %p202_p8 }
  0x18   :  { %210 = shalt.err (!%p207_p10)
}
  0x19   :  { %s211_s12 = scalar_lea.vmem %s30_s30, 128  ;;  %p216_p12 = scmp.lt.s32.totalorder %s30_s30, %s30_s30 }
  0x1a   :  { %p212_p11 = scmp.ne.s32.totalorder %s30_s30, %s211_s12  ;;  %p217_p13 = scmp.lt.s32.totalorder %s211_s12, %s211_s12 }
  0x1c   :  { %p218_p0 = por %p217_p13, %p216_p12 }
  0x1e   :  { %p219_p1 = pnand %p218_p0, %p212_p11 }
  0x20   :  { %222 = shalt.err (!%p219_p1)
}
  0x21   :  { %35 = dma.hbm_to_vmem [thread:$0]  %s301_s1, 128, %s30_s30, [#allocation6], %s228_s25, %s228_s25, %s229_s26  }
  0x22   :  { %223 = dma.done.wait [#allocation4], 128  }
  0x23   :  { %224 = vsyncadd [#allocation4], 4294967168 }
  0x24   :  { %225 = dma.done.wait [#allocation6], 128  }
  0x25   :  { %226 = vsyncadd [#allocation6], 4294967168  ;;  %v149_v0 = vld [vmem:[#allocation5] sm:$0xff]   ;;  %s231_s14 = smov 96   ;;  %v145_v6 = vld [vmem:[#allocation3] sm:$0xff]   ;;  %vm111_vm0 = vcmask 261120   ;;  %v119_v38 = vstv %s303_s3 }
  0x26   :  { %v150_v1 = vunpack.c.l.bf16 %v149_v0  ;;  %v151_v2 = vunpack.c.h.bf16 %v149_v0  ;;  %v146_v7 = vunpack.c.l.bf16 %v145_v6  ;;  %v147_v8 = vunpack.c.h.bf16 %v145_v6  ;;  %v143_v31 = vld [vmem:[%s302_s2] ss:$0 sm:$0xff] }
  0x27   :  { %vm134_vm1 = vcmask 7168  }
  0x28   :  { %v162_v3 = vpack.i.bf16 %v151_v2, %v150_v1  ;;  %v59_v4 = vmul.f32 %v151_v2, %v151_v2  ;;  %v58_v5 = vmul.f32 %v150_v1, %v150_v1  ;;  %v55_v9 = vmul.f32 %v147_v8, %v147_v8 }
  0x29   :  { %v54_v10 = vmul.f32 %v146_v7, %v146_v7  ;;  %v56_v11 = vadd.f32 %v150_v1, %v146_v7  ;;  %v57_v12 = vadd.f32 %v151_v2, %v147_v8 }
  0x2a   :  { %163 = vrot.lane.b32.xlu1 %v162_v3, %s228_s25  ;;  %158 = vrot.lane.b32.xlu0 %v162_v3, %s231_s14  ;;  %v61_v15 = vadd.f32 %v59_v4, %v55_v9 }
  0x2b   :  { %v60_v16 = vadd.f32 %v58_v5, %v54_v10 }
  0x2e   :  { %76 = vrot.lane.b32.xlu1 %v59_v4, %s231_s14  ;;  %74 = vrot.lane.b32.xlu0 %v58_v5, %s231_s14 }
  0x32   :  { %92 = vrot.lane.b32.xlu1 %v59_v4, %s228_s25  ;;  %90 = vrot.lane.b32.xlu0 %v58_v5, %s228_s25 }
  0x9c   :  { %v164_v13 = vpop.permute.xlu1 %163  ;;  %v159_v14 = vpop.permute.xlu0 %158 }
  0x9d   :  { %v175_v17 = vadd.low.f32.bf16 %v56_v11, %v159_v14  ;;  %v176_v18 = vadd.high.f32.bf16 %v57_v12, %v159_v14 }
  0x9f   :  { %v177_v21 = vadd.high.f32.bf16 %v176_v18, %v164_v13  ;;  %v178_v22 = vadd.low.f32.bf16 %v175_v17, %v164_v13 }
  0xa0   :  { %v77_v19 = vpop.permute.xlu1 %76  ;;  %v75_v20 = vpop.permute.xlu0 %74 }
  0xa1   :  { %v81_v23 = vadd.f32 %v77_v19, %v61_v15  ;;  %v80_v24 = vadd.f32 %v75_v20, %v60_v16  ;;  %v99_v28 = vmul.f32 %v177_v21, %v177_v21  ;;  %v98_v30 = vmul.f32 %v178_v22, %v178_v22 }
  0xa4   :  { %v93_v25 = vpop.permute.xlu1 %92  ;;  %v91_v26 = vpop.permute.xlu0 %90 }
  0xa5   :  { %v97_v27 = vadd.f32 %v93_v25, %v81_v23  ;;  %v96_v29 = vadd.f32 %v91_v26, %v80_v24 }
  0xa7   :  { %v101_v32 = vsub.f32 %v99_v28, %v97_v27  ;;  %v100_v33 = vsub.f32 %v98_v30, %v96_v29 }
  0xa9   :  { %v110_v34 = vmul.f32 %v143_v31, %v101_v32  ;;  %v109_v35 = vmul.f32 %v143_v31, %v100_v33 }
  0xab   :  { %v115_v36 = vsel %vm111_vm0, %v110_v34, 0.0  ;;  %v112_v37 = vsel %vm111_vm0, %v109_v35, 0.0 }
  0xac   :  { %116 = vadd.xlane.f32.xlu1 %v115_v36  ;;  %113 = vadd.xlane.f32.xlu0 %v112_v37 }
 0x139   :  { %v117_v39 = vpop.xlane.xlu1 %116  ;;  %v114_v40 = vpop.xlane.xlu0 %113 }
 0x13a   :  { %v121_v41 = vadd.f32 %v119_v38, %v117_v39  ;;  %v120_v42 = vadd.f32 %v119_v38, %v114_v40 }
 0x13c   :  { %v123_v43 = vsub.f32 0.0, %v121_v41  ;;  %v122_v44 = vsub.f32 0.0, %v120_v42 }
 0x13e   :  { %v126_v45 = vmul.f32 1.442695, %v123_v43  ;;  %v124_v46 = vmul.f32 1.442695, %v122_v44 }
 0x140   :  { %167 = vpow2.f32 %v126_v45 }
 0x141   :  { %169 = vpow2.f32 %v124_v46 }
 0x14a   :  { %v168_v47 = vpop.eup %167 }
 0x14b   :  { %v170_v48 = vpop.eup %169  ;;  %v129_v49 = vadd.f32 1.0, %v168_v47 }
 0x14c   :  { %v128_v50 = vadd.f32 1.0, %v170_v48 }
 0x14d   :  { %171 = vrcp.f32 %v129_v49 }
 0x14e   :  { %173 = vrcp.f32 %v128_v50 }
 0x157   :  { %v172_v51 = vpop.eup %171 }
 0x158   :  { %v174_v52 = vpop.eup %173  ;;  %136 = vst.msk [vmem:[%s304_s4 + $0x8] sm:$0xff] %vm134_vm1, %v172_v51 }
 0x159   :  { %135 = vst.msk [vmem:[%s304_s4] sm:$0xff] %vm134_vm1, %v174_v52 }
 0x15a   :  { %141 = vsyncpa [#allocation4], 1 }
 0x15b   :  { %142 = vsyncpa [#allocation6], 1 }

</bundles_post_ra>
